<compile_context>
chip_gen: v7x
topology: tpu7x:2x2x1
jax: 0.10.0
libtpu: 0.0.40
codegen_flags: <defaults>
</compile_context>

<pallas_src>
import functools

import jax
import jax.numpy as jnp
from jax.experimental import pallas as pl
from jax.experimental.pallas import tpu as pltpu

NEG_SLOPE = 0.01  # torch.nn.LeakyReLU default negative_slope


def _leaky_relu(x):
    return jnp.where(x >= 0, x, NEG_SLOPE * x)


# ----------------------------- kernels ------------------------------------ #

def _accumulate_side(a_ref, egok_ref, side_acc):
    """side_acc (f32 VMEM) += A[i-block, k-block] @ ego[k-block]  (bf16 MXU)."""
    @pl.when(pl.program_id(1) == 0)
    def _():
        side_acc[...] = jnp.zeros_like(side_acc)

    side_acc[...] += jnp.dot(a_ref[...], egok_ref[...],
                             preferred_element_type=jnp.float32)


def _gcn_kernel(a_ref, egok_ref, egoblk_ref, w_ref, b_ref, out_ref, side_acc):
    _accumulate_side(a_ref, egok_ref, side_acc)

    @pl.when(pl.program_id(1) == pl.num_programs(1) - 1)
    def _():
        h = egoblk_ref[...] + side_acc[...]                      # f32
        y = jnp.dot(h, w_ref[...],
                    preferred_element_type=jnp.float32) + b_ref[...]
        out_ref[...] = _leaky_relu(y).astype(out_ref.dtype)


def _graphsage_kernel(a_ref, egok_ref, egoblk_ref, w_ref, b_ref, out_ref,
                      side_acc, *, in_dim):
    _accumulate_side(a_ref, egok_ref, side_acc)

    @pl.when(pl.program_id(1) == pl.num_programs(1) - 1)
    def _():
        ego = egoblk_ref[...]
        side = side_acc[...]
        # concat([ego, side], 1) @ W == ego @ W[:in] + side @ W[in:].
        # Static slices start at sublane (8-row) boundaries, so no copies; the
        # epilogue runs once per row block and is off the critical path.
        y = (jnp.dot(ego, w_ref[0:in_dim, :],
                     preferred_element_type=jnp.float32)
             + jnp.dot(side, w_ref[in_dim:2 * in_dim, :],
                       preferred_element_type=jnp.float32)
             + b_ref[...])
        out_ref[...] = _leaky_relu(y).astype(out_ref.dtype)


def _bi_interaction_kernel(a_ref, egok_ref, egoblk_ref,
                           w1_ref, b1_ref, w2_ref, b2_ref, out_ref, side_acc):
    _accumulate_side(a_ref, egok_ref, side_acc)

    @pl.when(pl.program_id(1) == pl.num_programs(1) - 1)
    def _():
        ego = egoblk_ref[...]
        side = side_acc[...]
        s = _leaky_relu(
            jnp.dot(ego + side, w1_ref[...],
                    preferred_element_type=jnp.float32) + b1_ref[...])
        b = _leaky_relu(
            jnp.dot(ego * side, w2_ref[...],
                    preferred_element_type=jnp.float32) + b2_ref[...])
        out_ref[...] = (s + b).astype(out_ref.dtype)


# ----------------------------- wrapper ------------------------------------ #

def _round_up(x, m):
    return (x + m - 1) // m * m


def _pad2d(x, rows, cols):
    r, c = x.shape
    if r == rows and c == cols:
        return x
    return jnp.pad(x, ((0, rows - r), (0, cols - c)))


def aggregator_forward(ego, a_dense, params, aggregator_type, *, tm=512, tk=512):
    """Pallas implementation of Aggregator.forward (eval mode).

    Note: for tiny N (like the demo) a single fused XLA op would beat the grid
    overhead; the Pallas path is structured for production-scale N.
    """
    n, in_dim = ego.shape

    # Clamp tiles to the problem; pad A rows / cols independently.
    tm = min(tm, _round_up(n, 8))
    tk = min(tk, _round_up(n, 128))
    n_rows = _round_up(n, tm)       # A row axis / ego row block / output rows
    n_cols = _round_up(n, tk)       # A col axis / K-tiled ego rows
    grid = (n_rows // tm, n_cols // tk)

    out_dim = params["w1"].shape[1] if "w1" in params else params["w"].shape[1]
    out_pad = _round_up(out_dim, 128)   # lane-dense output stores

    # HBM-side casts / padding (bf16 only for the MXU inputs of A @ ego).
    a_bf16 = _pad2d(a_dense, n_rows, n_cols).astype(jnp.bfloat16)
    ego_bf16 = _pad2d(ego, n_cols, in_dim).astype(jnp.bfloat16)   # K-tiled input
    ego_f32 = _pad2d(ego, n_rows, in_dim)                         # row block (epilogue)

    a_spec = pl.BlockSpec((tm, tk), lambda i, k: (i, k))
    egok_spec = pl.BlockSpec((tk, in_dim), lambda i, k: (k, 0))
    # Row-blocked ego: index_map is constant in k, so it is only re-DMA'd when
    # the row block changes.
    egoblk_spec = pl.BlockSpec((tm, in_dim), lambda i, k: (i, 0))
    out_spec = pl.BlockSpec((tm, out_pad), lambda i, k: (i, 0))
    full = lambda shape: pl.BlockSpec(shape, lambda i, k: (0, 0))

    def pad_cols(w):
        return _pad2d(w, w.shape[0], out_pad)

    if aggregator_type == "gcn":
        kernel = _gcn_kernel
        w, b = pad_cols(params["w"]), pad_cols(params["b"])
        extra_args = (w, b)
        extra_specs = [full(w.shape), full(b.shape)]
        epilogue_flops = 2 * n_rows * in_dim * out_pad
    elif aggregator_type == "graphsage":
        kernel = functools.partial(_graphsage_kernel, in_dim=in_dim)
        w, b = pad_cols(params["w"]), pad_cols(params["b"])
        extra_args = (w, b)
        extra_specs = [full(w.shape), full(b.shape)]
        epilogue_flops = 2 * n_rows * (2 * in_dim) * out_pad
    elif aggregator_type == "bi-interaction":
        kernel = _bi_interaction_kernel
        w1, b1 = pad_cols(params["w1"]), pad_cols(params["b1"])
        w2, b2 = pad_cols(params["w2"]), pad_cols(params["b2"])
        extra_args = (w1, b1, w2, b2)
        extra_specs = [full(w1.shape), full(b1.shape),
                       full(w2.shape), full(b2.shape)]
        epilogue_flops = 2 * (2 * n_rows * in_dim * out_pad)
    else:
        raise NotImplementedError(aggregator_type)

    bytes_accessed = (a_bf16.size * 2 + ego_bf16.size * 2 + ego_f32.size * 4
                      + sum(x.size * 4 for x in extra_args)
                      + n_rows * out_pad * ego.dtype.itemsize)
    cost = pl.CostEstimate(
        flops=2 * n_rows * n_cols * in_dim + epilogue_flops,
        transcendentals=0,
        bytes_accessed=bytes_accessed,
    )

    fn = pl.pallas_call(
        kernel,
        out_shape=jax.ShapeDtypeStruct((n_rows, out_pad), ego.dtype),
        grid_spec=pltpu.PrefetchScalarGridSpec(
            num_scalar_prefetch=0,
            grid=grid,
            in_specs=[a_spec, egok_spec, egoblk_spec] + extra_specs,
            out_specs=out_spec,
            scratch_shapes=[pltpu.VMEM((tm, in_dim), jnp.float32)],
        ),
        compiler_params=pltpu.CompilerParams(
            dimension_semantics=("parallel", "arbitrary"),
            vmem_limit_bytes=32 * 1024 * 1024,
        ),
        cost_estimate=cost,
    )
    out = fn(a_bf16, ego_bf16, ego_f32, *extra_args)
    return out[:n, :out_dim]


# ---------------------- pure-JAX reference (semantics) --------------------- #

def aggregator_reference(ego, a_dense, params, aggregator_type):
    side = a_dense @ ego
    if aggregator_type == "gcn":
        h = ego + side
        return _leaky_relu(h @ params["w"] + params["b"])
    elif aggregator_type == "graphsage":
        h = jnp.concatenate([ego, side], axis=1)
        return _leaky_relu(h @ params["w"] + params["b"])
    elif aggregator_type == "bi-interaction":
        s = _leaky_relu((ego + side) @ params["w1"] + params["b1"])
        b = _leaky_relu((ego * side) @ params["w2"] + params["b2"])
        return s + b
    raise NotImplementedError(aggregator_type)


# ----------------------------- param init --------------------------------- #

def _xavier_normal(key, fan_in, fan_out):
    std = (2.0 / (fan_in + fan_out)) ** 0.5
    # stored transposed: (in, out)
    return std * jax.random.normal(key, (fan_in, fan_out), dtype=jnp.float32)


def make_params(key, in_dim, out_dim, aggregator_type):
    keys = jax.random.split(key, 4)
    if aggregator_type == "gcn":
        return {"w": _xavier_normal(keys[0], in_dim, out_dim),
                "b": 0.01 * jax.random.normal(keys[1], (1, out_dim), jnp.float32)}
    if aggregator_type == "graphsage":
        return {"w": _xavier_normal(keys[0], 2 * in_dim, out_dim),
                "b": 0.01 * jax.random.normal(keys[1], (1, out_dim), jnp.float32)}
    if aggregator_type == "bi-interaction":
        return {"w1": _xavier_normal(keys[0], in_dim, out_dim),
                "b1": 0.01 * jax.random.normal(keys[1], (1, out_dim), jnp.float32),
                "w2": _xavier_normal(keys[2], in_dim, out_dim),
                "b2": 0.01 * jax.random.normal(keys[3], (1, out_dim), jnp.float32)}
    raise NotImplementedError(aggregator_type)


# ------------------------------- main -------------------------------------- #

if __name__ == "__main__":
    key = jax.random.PRNGKey(0)
    k_ego, k_adj, k_par = jax.random.split(key, 3)

    N, IN_DIM, OUT_DIM = 256, 64, 64
    TM, TK = 128, 128   # grid (2, 2): >=2 row blocks for v7x megacore

    ego = jax.random.normal(k_ego, (N, IN_DIM), dtype=jnp.float32)

    # Sparse-ish normalized adjacency, materialized dense (A_in in the module
    # is a torch.sparse.FloatTensor; spmm == dense matmul semantically).
    raw = jax.random.uniform(k_adj, (N, N), dtype=jnp.float32)
    mask = (raw > 0.9).astype(jnp.float32)
    deg = jnp.maximum(mask.sum(axis=1, keepdims=True), 1.0)
    a_dense = mask / deg

    ok = True
    for i, agg_type in enumerate(["gcn", "graphsage", "bi-interaction"]):
        params = make_params(jax.random.fold_in(k_par, i), IN_DIM, OUT_DIM, agg_type)
        out = aggregator_forward(ego, a_dense, params, agg_type, tm=TM, tk=TK)
        out = jax.block_until_ready(out)
        ref = aggregator_reference(ego, a_dense, params, agg_type)
        # A/ego are fed to the MXU in bf16 (f32 accumulation) -> loosened tol
        # vs. the pure-f32 reference.
        if not bool(jnp.allclose(out, ref, atol=2e-2, rtol=2e-2)):
            ok = False
            print(f"MISMATCH for {agg_type}: max err "
                  f"{float(jnp.max(jnp.abs(out - ref)))}")

    if ok:
        print("KERNEL_OK")
</pallas_src>

<mosaic_0001>
module attributes {stable_mosaic.version = 11 : i64} {
  func.func @_gcn_kernel(%arg0: i32, %arg1: i32, %arg2: memref<128x128xbf16, #tpu.memory_space<vmem>>, %arg3: memref<128x64xbf16, #tpu.memory_space<vmem>>, %arg4: memref<128x64xf32, #tpu.memory_space<vmem>>, %arg5: memref<64x128xf32, #tpu.memory_space<vmem>>, %arg6: memref<1x128xf32, #tpu.memory_space<vmem>>, %arg7: memref<128x128xf32, #tpu.memory_space<vmem>>, %arg8: memref<128x64xf32, #tpu.memory_space<vmem>>) attributes {dimension_semantics = [#tpu.dimension_semantics<parallel>, #tpu.dimension_semantics<arbitrary>], iteration_bounds = array<i64: 2, 2>, scalar_prefetch = 0 : i64, scratch_operands = 1 : i64, tpu.core_type = #tpu.core_type<tc>, window_params = [{transform_indices = @transform_0, window_bounds = array<i64: 128, 128>}, {transform_indices = @transform_1, window_bounds = array<i64: 128, 64>}, {transform_indices = @transform_2, window_bounds = array<i64: 128, 64>}, {pipeline_mode = #tpu.pipeline_mode<synchronous>, transform_indices = @transform_3, window_bounds = array<i64: 64, 128>}, {pipeline_mode = #tpu.pipeline_mode<synchronous>, transform_indices = @transform_4, window_bounds = array<i64: 1, 128>}, {transform_indices = @transform_5, window_bounds = array<i64: 128, 128>}]} {
    %c0_i32 = arith.constant 0 : i32
    %0 = arith.cmpi eq, %arg1, %c0_i32 : i32
    %1 = arith.extui %0 : i1 to i32
    %c0_i32_0 = arith.constant 0 : i32
    %2 = arith.cmpi ne, %1, %c0_i32_0 : i32
    scf.if %2 {
      %cst_9 = arith.constant 0.000000e+00 : f32
      %12 = vector.broadcast %cst_9 : f32 to vector<128x64xf32>
      %c0_10 = arith.constant 0 : index
      %c0_11 = arith.constant 0 : index
      %13 = vector.load %arg8[%c0_10, %c0_11] : memref<128x64xf32, #tpu.memory_space<vmem>>, vector<128x64xf32>
      tpu.vector_store %arg8[%c0_10, %c0_11], %12 {strides = array<i32>} : memref<128x64xf32, #tpu.memory_space<vmem>>, vector<128x64xf32>,
    } else {
    }
    %c0 = arith.constant 0 : index
    %c0_1 = arith.constant 0 : index
    %3 = vector.load %arg8[%c0, %c0_1] : memref<128x64xf32, #tpu.memory_space<vmem>>, vector<128x64xf32>
    %c0_2 = arith.constant 0 : index
    %c0_3 = arith.constant 0 : index
    %4 = vector.load %arg2[%c0_2, %c0_3] : memref<128x128xbf16, #tpu.memory_space<vmem>>, vector<128x128xbf16>
    %c0_4 = arith.constant 0 : index
    %c0_5 = arith.constant 0 : index
    %5 = vector.load %arg3[%c0_4, %c0_5] : memref<128x64xbf16, #tpu.memory_space<vmem>>, vector<128x64xbf16>
    %cst = arith.constant dense<0.000000e+00> : vector<128x64xf32>
    %6 = tpu.matmul %4, %5, %cst {dimension_numbers = #tpu.dot_dimension_numbers<[1], [0], [0], [1], [0, 0, 1, 1], [], []>} : vector<128x128xbf16>, vector<128x64xbf16>, vector<128x64xf32> -> vector<128x64xf32>
    %7 = arith.addf %3, %6 : vector<128x64xf32>
    %c0_6 = arith.constant 0 : index
    %c0_7 = arith.constant 0 : index
    %8 = vector.load %arg8[%c0_6, %c0_7] : memref<128x64xf32, #tpu.memory_space<vmem>>, vector<128x64xf32>
    tpu.vector_store %arg8[%c0_6, %c0_7], %7 {strides = array<i32>} : memref<128x64xf32, #tpu.memory_space<vmem>>, vector<128x64xf32>,
    %c1_i32 = arith.constant 1 : i32
    %9 = arith.cmpi eq, %arg1, %c1_i32 : i32
    %10 = arith.extui %9 : i1 to i32
    %c0_i32_8 = arith.constant 0 : i32
    %11 = arith.cmpi ne, %10, %c0_i32_8 : i32
    scf.if %11 {
      %c0_9 = arith.constant 0 : index
      %c0_10 = arith.constant 0 : index
      %12 = vector.load %arg4[%c0_9, %c0_10] : memref<128x64xf32, #tpu.memory_space<vmem>>, vector<128x64xf32>
      %c0_11 = arith.constant 0 : index
      %c0_12 = arith.constant 0 : index
      %13 = vector.load %arg8[%c0_11, %c0_12] : memref<128x64xf32, #tpu.memory_space<vmem>>, vector<128x64xf32>
      %14 = arith.addf %12, %13 : vector<128x64xf32>
      %c0_13 = arith.constant 0 : index
      %c0_14 = arith.constant 0 : index
      %15 = vector.load %arg5[%c0_13, %c0_14] : memref<64x128xf32, #tpu.memory_space<vmem>>, vector<64x128xf32>
      %cst_15 = arith.constant dense<0.000000e+00> : vector<128x128xf32>
      %16 = tpu.matmul %14, %15, %cst_15 {dimension_numbers = #tpu.dot_dimension_numbers<[1], [0], [0], [1], [0, 0, 1, 1], [], []>} : vector<128x64xf32>, vector<64x128xf32>, vector<128x128xf32> -> vector<128x128xf32>
      %c0_16 = arith.constant 0 : index
      %c0_17 = arith.constant 0 : index
      %17 = vector.load %arg6[%c0_16, %c0_17] : memref<1x128xf32, #tpu.memory_space<vmem>>, vector<1x128xf32>
      %18 = vector.broadcast %17 : vector<1x128xf32> to vector<128x128xf32>
      %19 = arith.addf %16, %18 : vector<128x128xf32>
      %cst_18 = arith.constant 0.000000e+00 : f32
      %20 = vector.broadcast %cst_18 : f32 to vector<128x128xf32>
      %21 = arith.cmpf oge, %19, %20 : vector<128x128xf32>
      %cst_19 = arith.constant 0.00999999977 : f32
      %22 = vector.broadcast %cst_19 : f32 to vector<128x128xf32>
      %23 = arith.mulf %22, %19 : vector<128x128xf32>
      %24 = arith.select %21, %19, %23 : vector<128x128xi1>, vector<128x128xf32>
      %c0_20 = arith.constant 0 : index
      %c0_21 = arith.constant 0 : index
      %25 = vector.load %arg7[%c0_20, %c0_21] : memref<128x128xf32, #tpu.memory_space<vmem>>, vector<128x128xf32>
      tpu.vector_store %arg7[%c0_20, %c0_21], %24 {strides = array<i32>} : memref<128x128xf32, #tpu.memory_space<vmem>>, vector<128x128xf32>,
    } else {
    }
    return
  }
  func.func @transform_0(%arg0: i32, %arg1: i32) -> (i32, i32) {
    %c0_i32 = arith.constant 0 : i32
    return %arg0, %arg1 : i32, i32
  }
  func.func @transform_1(%arg0: i32, %arg1: i32) -> (i32, i32) {
    %c0_i32 = arith.constant 0 : i32
    %c0_i32_0 = arith.constant 0 : i32
    return %arg1, %c0_i32 : i32, i32
  }
  func.func @transform_2(%arg0: i32, %arg1: i32) -> (i32, i32) {
    %c0_i32 = arith.constant 0 : i32
    %c0_i32_0 = arith.constant 0 : i32
    return %arg0, %c0_i32 : i32, i32
  }
  func.func @transform_3(%arg0: i32, %arg1: i32) -> (i32, i32) {
    %c0_i32 = arith.constant 0 : i32
    %c0_i32_0 = arith.constant 0 : i32
    %c0_i32_1 = arith.constant 0 : i32
    return %c0_i32, %c0_i32_0 : i32, i32
  }
  func.func @transform_4(%arg0: i32, %arg1: i32) -> (i32, i32) {
    %c0_i32 = arith.constant 0 : i32
    %c0_i32_0 = arith.constant 0 : i32
    %c0_i32_1 = arith.constant 0 : i32
    return %c0_i32, %c0_i32_0 : i32, i32
  }
  func.func @transform_5(%arg0: i32, %arg1: i32) -> (i32, i32) {
    %c0_i32 = arith.constant 0 : i32
    %c0_i32_0 = arith.constant 0 : i32
    return %arg0, %c0_i32 : i32, i32
  }
}

</mosaic_0001>

<bundles_post_ra>
// kernel: tpu_custom_call.1
= control target key start
LH: loop header
LB: loop body
LE: loop exit
PB: predicated region body
PF: predicated region fallthrough
CT: control target
= control target key end

     0   :  { %s1938_s0 = inlined_call_operand.vmem [shape: bf16[256,256], index: 0, kind: input, shape index: {}]   ;;  %s1939_s1 = inlined_call_operand.vmem [shape: bf16[256,64], index: 1, kind: input, shape index: {}]   ;;  %s1940_s2 = inlined_call_operand.vmem [shape: f32[256,64], index: 2, kind: input, shape index: {}]   ;;  %s1941_s3 = inlined_call_operand.vmem [shape: f32[64,128], index: 3, kind: input, shape index: {}]   ;;  %s1942_s4 = inlined_call_operand.vmem [shape: f32[1,128], index: 4, kind: input, shape index: {}]   ;;  %s1943_s5 = inlined_call_operand.hbm [shape: f32[256,128], index: 5, kind: output, shape index: {}]  }
   0x1   :  { %1948 = sst [smem:[#allocation10_spill]] %s1938_s0 }
   0x2   :  { %10 = vsyncpa [#allocation5], 0 }
   0x3   :  { %12 = vsyncpa [#allocation5 + $0x1], 0  ;;  %s1587_s18 = smov 0   ;;  %s1589_s19 = smov 0  }
   0x4   :  { %s1591_s20 = smov 0   ;;  %s1593_s21 = smov 0  }
   0x5   :  { %s1595_s22 = smov 0   ;;  %s1597_s23 = smov 0  }
   0x6   :  { %s1599_s24 = smov 0   ;;  %s1601_s25 = smov 0  }
   0x7   :  { %s1603_s26 = smov 0   ;;  %s1605_s27 = smov 0  }
   0x8 LB: > { %1949 = sst [smem:[#allocation7_spill]] %s1547_s26  ;;  %s1126_s28 = sadd.s32 4294967295, %s1551_s27   ;;  %s1551_s27 = sphi %s1605_s27, %s18_s27   ;;  %s1547_s26 = sphi %s1603_s26, %s1959_s26   ;;  %s1543_s25 = sphi %s1601_s25, %s1966_s25   ;;  %s1539_s24 = sphi %s1599_s24, %s1957_s24   ;;  %s1535_s23 = sphi %s1597_s23, %s1965_s23   ;;  %s1531_s22 = sphi %s1595_s22, %s1964_s22   ;;  %s1527_s21 = sphi %s1593_s21, %s1963_s21   ;;  %s1523_s20 = sphi %s1591_s20, %s1962_s20   ;;  %s1519_s19 = sphi %s1589_s19, %s1961_s19   ;;  %s1515_s18 = sphi %s1587_s18, %s1960_s18  }
   0x9   : > { %s1127_s29 = sadd.s32 4294967294, %s1551_s27   ;;  %s27_s30 = sadd.s32 1, %s1543_s25 }
   0xa   : > { %s30_s6 = sadd.s32 1, %s1547_s26  ;;  %p28_p0 = scmp.ge.s32.totalorder %s27_s30, 2 }
   0xb   : > { %s39_s7 = sadd.s32 1, %s1531_s22  ;;  %p46_p1 = scmp.ne.s32.totalorder %s1531_s22, %s1527_s21 }
   0xc   : > { %p47_p2 = scmp.eq.s32.totalorder %s1551_s27, 0  ;;  %s1968_s30 = smov (%p28_p0, %s27_s30), 0 }
   0xd   : > { %1950 = sst [smem:[#allocation8_spill]] %s1968_s30  ;;  %s1970_s6 = smov (!%p28_p0, %s30_s6), %s1547_s26 }
   0xe   : > { %s35_s8 = ssub.s32 %s1543_s25, %s1968_s30  ;;  %p1650_p3 = por %p47_p2, %p46_p1 }
   0xf   : > { %p32_p4 = scmp.ge.s32.totalorder %s1970_s6, 2  ;;  %s159_s10 = sadd.s32 1, %s1523_s20 }
  0x10   : > { %p169_p5 = scmp.ne.s32.totalorder %s1523_s20, %s1519_s19  ;;  %p170_p6 = scmp.eq.s32.totalorder %s1126_s28, 3 }
  0x11   : > { %s1972_s6 = smov (%p32_p4, %s1970_s6), 0  ;;  %p175_p8 = scmp.ne.s32.totalorder %s1519_s19, %s1515_s18 }
  0x12   : > { %1952 = sst [smem:[#allocation9_spill]] %s1972_s6  ;;  %p1659_p7 = por %p170_p6, %p169_p5 }
  0x13   : > { %s34_s12 = ssub.s32 %s1547_s26, %s1972_s6  ;;  %p176_p9 = scmp.eq.s32.totalorder %s1127_s29, 3 }
  0x14   : > { %s36_s13 = sor.u32 %s35_s8, %s34_s12  ;;  %p157_p10 = scmp.eq.s32.totalorder %s34_s12, 0 }
  0x15   : > { %p37_p11 = scmp.eq.s32.totalorder %s36_s13, 0  ;;  %p1667_p12 = por %p176_p9, %p175_p8 }
  0x16   : > { %s1672_s15 = scalar_select %p157_p10, %s1523_s20, %s159_s10  }
  0x17   : > { %s1675_s16 = scalar_select %p37_p11, %s1531_s22, %s39_s7  }
  0x18   : > { %p1129_p13 = scmp.ge.s32.totalorder %s1551_s27, 4 }
  0x1a   : > { %198 = sbr.rel (%p1129_p13) target bundleno = 53 (0x35), region = 24 }
  0x21   : > { %201 = sbr.rel (!%p1650_p3) target bundleno = 53 (0x35), region = 28  ;;  %s203_s17 = sand.u32 (%p1650_p3), 1, %s1531_s22  }
  0x22   : > { %s1181_s28 = sshll.u32 (%p1650_p3), %s1547_s26, 5  ;;  %s1130_s29 = sshll.u32 (%p1650_p3), %s203_s17, 6 }
  0x23   : > { %s208_s8 = sadd.s32 (%p1650_p3), %s1543_s25, %s1181_s28  ;;  %s1955_s0 = sld [smem:[#allocation10_spill]] (%p1650_p3) }
  0x24   : > { %s1133_s12 = sshll.u32 (%p1650_p3), %s208_s8, 2  ;;  %s205_s7 = scalar_lea.vmem (%p1650_p3), [#allocation3], %s1130_s29 }
  0x29   : > { %s1686_s10 = scalar_lea.vmem %s1955_s0, %s1133_s12 }
  0x2a   : > { %v226_v0 = vld [vmem:[%s1686_s10] sm:$0xf]  ;;  %v228_v1 = vld [vmem:[%s1686_s10 + $0x8] sm:$0xf]  ;;  %v230_v2 = vld [vmem:[%s1686_s10 + $0x10] sm:$0xf] }
  0x2b   : > { %227 = vst [vmem:[%s205_s7] sm:$0xf] %v226_v0  ;;  %229 = vst [vmem:[%s205_s7 + $0x4] sm:$0xf] %v228_v1  ;;  %v232_v3 = vld [vmem:[%s1686_s10 + $0x18] sm:$0xf] }
  0x2c   : > { %231 = vst [vmem:[%s205_s7 + $0x8] sm:$0xf] %v230_v2  ;;  %v234_v4 = vld [vmem:[%s1686_s10 + $0x20] sm:$0xf]  ;;  %v236_v5 = vld [vmem:[%s1686_s10 + $0x28] sm:$0xf] }
  0x2d   : > { %233 = vst [vmem:[%s205_s7 + $0xc] sm:$0xf] %v232_v3  ;;  %235 = vst [vmem:[%s205_s7 + $0x10] sm:$0xf] %v234_v4  ;;  %v238_v6 = vld [vmem:[%s1686_s10 + $0x30] sm:$0xf] }
  0x2e   : > { %237 = vst [vmem:[%s205_s7 + $0x14] sm:$0xf] %v236_v5  ;;  %v240_v7 = vld [vmem:[%s1686_s10 + $0x38] sm:$0xf]  ;;  %v242_v8 = vld [vmem:[%s1686_s10 + $0x40] sm:$0xf] }
  0x2f   : > { %239 = vst [vmem:[%s205_s7 + $0x18] sm:$0xf] %v238_v6  ;;  %241 = vst [vmem:[%s205_s7 + $0x1c] sm:$0xf] %v240_v7  ;;  %v244_v9 = vld [vmem:[%s1686_s10 + $0x48] sm:$0xf] }
  0x30   : > { %243 = vst [vmem:[%s205_s7 + $0x20] sm:$0xf] %v242_v8  ;;  %v246_v10 = vld [vmem:[%s1686_s10 + $0x50] sm:$0xf]  ;;  %v248_v11 = vld [vmem:[%s1686_s10 + $0x58] sm:$0xf] }
  0x31   : > { %245 = vst [vmem:[%s205_s7 + $0x24] sm:$0xf] %v244_v9  ;;  %247 = vst [vmem:[%s205_s7 + $0x28] sm:$0xf] %v246_v10  ;;  %v250_v12 = vld [vmem:[%s1686_s10 + $0x60] sm:$0xf] }
  0x32   : > { %249 = vst [vmem:[%s205_s7 + $0x2c] sm:$0xf] %v248_v11  ;;  %v252_v13 = vld [vmem:[%s1686_s10 + $0x68] sm:$0xf]  ;;  %v254_v14 = vld [vmem:[%s1686_s10 + $0x70] sm:$0xf] }
  0x33   : > { %251 = vst [vmem:[%s205_s7 + $0x30] sm:$0xf] %v250_v12  ;;  %253 = vst [vmem:[%s205_s7 + $0x34] sm:$0xf] %v252_v13  ;;  %v256_v15 = vld [vmem:[%s1686_s10 + $0x78] sm:$0xf] }
  0x34   : > { %255 = vst [vmem:[%s205_s7 + $0x38] sm:$0xf] %v254_v14  ;;  %257 = vst [vmem:[%s205_s7 + $0x3c] sm:$0xf] %v256_v15 }
  0x35 PF: > { %p1134_p0 = scmp.ge.s32.totalorder %s1551_s27, 1  ;;  %p329_p1 = scmp.lt.s32.totalorder %s1551_s27, 5 }
  0x37   : > { %p330_p2 = pnand %p1134_p0, %p329_p1 }
  0x38   : > { %s336_s6 = sand.u32 (!%p330_p2), 1, %s1527_s21   ;;  %s1947_s9 = sand.u32 (!%p330_p2), 1, %s1519_s19  }
  0x39   : > { %333 = sbr.rel (%p330_p2) target bundleno = 593 (0x251), region = 77  ;;  %s1135_s17 = sshll.u32 (!%p330_p2), %s336_s6, 6 }
  0x3a   : > { %s1136_s28 = sshll.u32 (!%p330_p2), %s1947_s9, 7  ;;  %s1137_s29 = sshll.u32 (!%p330_p2), %s1535_s23, 4 }
  0x3b   : > { %s1139_s8 = sshll.u32 (!%p330_p2), %s1539_s24, 4  ;;  %p375_p3 = scmp.lt.s32.totalorder (!%p330_p2), %s1137_s29, 31 }
  0x3c   : > { %p381_p4 = scmp.lt.s32.totalorder (!%p330_p2), %s1139_s8, 31  ;;  %s1722_s6 = scalar_lea.vmem (!%p330_p2), [#allocation3], %s1135_s17 }
  0x3d   : > { %s1724_s9 = scalar_lea.vmem (!%p330_p2), [#allocation4], %s1136_s28  ;;  %p1141_p5 = scmp.ne.s32.totalorder (!%p330_p2), %s1535_s23, 0 }
  0x40   : > { %s1974_s29 = smov (!%p375_p3, %s1137_s29), 31  ;;  %s1976_s8 = smov (!%p381_p4, %s1139_s8), 31 }
  0x41   : > { %s1138_s12 = sshll.u32 %s1974_s29, 2  ;;  %s1140_s0 = sshll.u32 %s1976_s8, 3  ;;  %vm392_vm0 = vcmask (!%p1141_p5), 523264   ;;  %v1553_v16 = vmov (!%p1141_p5), 0.0  }
  0x42   : > { %s1715_s7 = scalar_lea.vmem %s1939_s1, %s1138_s12  ;;  %s1720_s21 = scalar_lea.vmem %s1940_s2, %s1140_s0  ;;  %393 = vst.msk [vmem:[#allocation2] sm:$0xff] (!%p1141_p5), %vm392_vm0, %v1553_v16  ;;  %394 = vst.msk [vmem:[#allocation2 + $0x8] sm:$0xff] (!%p1141_p5), %vm392_vm0, %v1553_v16 }
  0x43   : > { %391 = sbr.rel (%p1141_p5) target bundleno = 74 (0x4a), region = 85  ;;  %395 = vst.msk [vmem:[#allocation2 + $0x10] sm:$0xff] (!%p1141_p5), %vm392_vm0, %v1553_v16  ;;  %396 = vst.msk [vmem:[#allocation2 + $0x18] sm:$0xff] (!%p1141_p5), %vm392_vm0, %v1553_v16 }
  0x44   : > { %397 = vst.msk [vmem:[#allocation2 + $0x20] sm:$0xff] (!%p1141_p5), %vm392_vm0, %v1553_v16  ;;  %398 = vst.msk [vmem:[#allocation2 + $0x28] sm:$0xff] (!%p1141_p5), %vm392_vm0, %v1553_v16 }
  0x45   : > { %399 = vst.msk [vmem:[#allocation2 + $0x30] sm:$0xff] (!%p1141_p5), %vm392_vm0, %v1553_v16  ;;  %400 = vst.msk [vmem:[#allocation2 + $0x38] sm:$0xff] (!%p1141_p5), %vm392_vm0, %v1553_v16 }
  0x46   : > { %401 = vst.msk [vmem:[#allocation2 + $0x40] sm:$0xff] (!%p1141_p5), %vm392_vm0, %v1553_v16  ;;  %402 = vst.msk [vmem:[#allocation2 + $0x48] sm:$0xff] (!%p1141_p5), %vm392_vm0, %v1553_v16 }
  0x47   : > { %403 = vst.msk [vmem:[#allocation2 + $0x50] sm:$0xff] (!%p1141_p5), %vm392_vm0, %v1553_v16  ;;  %404 = vst.msk [vmem:[#allocation2 + $0x58] sm:$0xff] (!%p1141_p5), %vm392_vm0, %v1553_v16 }
  0x48   : > { %405 = vst.msk [vmem:[#allocation2 + $0x60] sm:$0xff] (!%p1141_p5), %vm392_vm0, %v1553_v16  ;;  %406 = vst.msk [vmem:[#allocation2 + $0x68] sm:$0xff] (!%p1141_p5), %vm392_vm0, %v1553_v16 }
  0x49   : > { %407 = vst.msk [vmem:[#allocation2 + $0x70] sm:$0xff] (!%p1141_p5), %vm392_vm0, %v1553_v16  ;;  %408 = vst.msk [vmem:[#allocation2 + $0x78] sm:$0xff] (!%p1141_p5), %vm392_vm0, %v1553_v16 }
  0x4a PF: > { %v1425_v17 = vld [vmem:[%s1715_s7] sm:$0xff]   ;;  %v1426_v18 = vld [vmem:[%s1715_s7 + $0x8] sm:$0xff]   ;;  %v1427_v19 = vld [vmem:[%s1715_s7 + $0x10] sm:$0xff]   ;;  %vm666_vm1 = vcmask 523264   ;;  %p1158_p6 = scmp.ne.s32.totalorder %s1535_s23, 1 }
  0x4b   : > { %1223 = vmatprep.subr.bf16.mxu0 %v1425_v17  ;;  %1311 = vmatprep.subr.bf16.mxu1 %v1425_v17  ;;  %v1428_v20 = vld [vmem:[%s1715_s7 + $0x18] sm:$0xff]   ;;  %v1433_v21 = vld [vmem:[%s1722_s6] sm:$0xff]   ;;  %v1430_v24 = vld [vmem:[%s1715_s7 + $0x28] sm:$0xff]  }
  0x4c   : > { %1224 = vmatpush3.bf16.msra.mxu0 %v1425_v17  ;;  %1319 = vmatpush3.bf16.msra.mxu1 %v1425_v17  ;;  %v1434_v22 = vld [vmem:[%s1722_s6 + $0x20] sm:$0xff]   ;;  %v1431_v25 = vld [vmem:[%s1715_s7 + $0x30] sm:$0xff]   ;;  %v1432_v26 = vld [vmem:[%s1715_s7 + $0x38] sm:$0xff]  }
  0x4d   : > { %1225 = vmatprep.subr.bf16.mxu0 %v1426_v18  ;;  %1312 = vmatprep.subr.bf16.mxu1 %v1426_v18  ;;  %v1429_v23 = vld [vmem:[%s1715_s7 + $0x20] sm:$0xff]   ;;  %v1435_v27 = vld [vmem:[%s1722_s6 + $0x8] sm:$0xff]   ;;  %v1437_v29 = vld [vmem:[%s1722_s6 + $0x10] sm:$0xff]  }
  0x4e   : > { %1239 = vmatprep.mubr.bf16.mxu0 %v1433_v21  ;;  %1247 = vmatprep.mubr.bf16.mxu1 %v1434_v22  ;;  %v1436_v28 = vld [vmem:[%s1722_s6 + $0x28] sm:$0xff]   ;;  %v1438_v30 = vld [vmem:[%s1722_s6 + $0x30] sm:$0xff]   ;;  %v1439_v31 = vld [vmem:[%s1722_s6 + $0x18] sm:$0xff]  }
  0x4f   : > { %v1440_v32 = vld [vmem:[%s1722_s6 + $0x38] sm:$0xff]   ;;  %v411_v33 = vld [vmem:[#allocation2 + $0x10] sm:$0xff]  ;;  %v409_v35 = vld [vmem:[#allocation2] sm:$0xff] }
  0x50   : > { %1226 = vmatpush3.bf16.msra.mxu0 %v1426_v18  ;;  %1320 = vmatpush3.bf16.msra.mxu1 %v1426_v18  ;;  %v419_v34 = vld [vmem:[#allocation2 + $0x50] sm:$0xff]  ;;  %v417_v36 = vld [vmem:[#allocation2 + $0x40] sm:$0xff]  ;;  %v412_v39 = vld [vmem:[#allocation2 + $0x18] sm:$0xff] }
  0x51   : > { %1227 = vmatprep.subr.bf16.mxu0 %v1427_v19  ;;  %1313 = vmatprep.subr.bf16.mxu1 %v1427_v19  ;;  %v420_v40 = vld [vmem:[#allocation2 + $0x58] sm:$0xff]  ;;  %v410_v45 = vld [vmem:[#allocation2 + $0x8] sm:$0xff]  ;;  %v415_v57 = vld [vmem:[#allocation2 + $0x30] sm:$0xff] }
  0x52   : > { %v418_v46 = vld [vmem:[#allocation2 + $0x48] sm:$0xff]  ;;  %v423_v58 = vld [vmem:[#allocation2 + $0x70] sm:$0xff]  ;;  %v413_v59 = vld [vmem:[#allocation2 + $0x20] sm:$0xff] }
  0x53   : > { %v421_v60 = vld [vmem:[#allocation2 + $0x60] sm:$0xff]  ;;  %v416_v63 = vld [vmem:[#allocation2 + $0x38] sm:$0xff]  ;;  %v414_v5 = vld [vmem:[#allocation2 + $0x28] sm:$0xff] }
  0x54   : > { %1228 = vmatpush3.bf16.msra.mxu0 %v1427_v19  ;;  %1321 = vmatpush3.bf16.msra.mxu1 %v1427_v19  ;;  %v424_v0 = vld [vmem:[#allocation2 + $0x78] sm:$0xff]  ;;  %v422_v6 = vld [vmem:[#allocation2 + $0x68] sm:$0xff]  ;;  %v735_v17 = vld [vmem:[%s1941_s3] sm:$0xff] (!%p1158_p6) }
  0x55   : > { %1229 = vmatprep.subr.bf16.mxu0 %v1428_v20  ;;  %1314 = vmatprep.subr.bf16.mxu1 %v1428_v20  ;;  %v736_v18 = vld [vmem:[%s1941_s3 + $0x8] sm:$0xff] (!%p1158_p6)  ;;  %v737_v19 = vld [vmem:[%s1941_s3 + $0x10] sm:$0xff] (!%p1158_p6)  ;;  %v738_v21 = vld [vmem:[%s1941_s3 + $0x18] sm:$0xff] (!%p1158_p6) }
  0x56   : > { %v1299_v22 = vpack.c.bf16 (!%p1158_p6), %v738_v21, %v737_v19 }
  0x58   : > { %1230 = vmatpush3.bf16.msra.mxu0 %v1428_v20  ;;  %1322 = vmatpush3.bf16.msra.mxu1 %v1428_v20  ;;  %v1295_v20 = vpack.c.bf16 (!%p1158_p6), %v736_v18, %v735_v17 }
  0x59   : > { %1231 = vmatprep.subr.bf16.mxu0 %v1429_v23  ;;  %1315 = vmatprep.subr.bf16.mxu1 %v1429_v23 }
  0x5c   : > { %1232 = vmatpush3.bf16.msra.mxu0 %v1429_v23  ;;  %1323 = vmatpush3.bf16.msra.mxu1 %v1429_v23  ;;  %v739_v23 = vld [vmem:[%s1941_s3 + $0x20] sm:$0xff] (!%p1158_p6) }
  0x5d   : > { %1233 = vmatprep.subr.bf16.mxu0 %v1430_v24  ;;  %1316 = vmatprep.subr.bf16.mxu1 %v1430_v24 }
  0x60   : > { %1234 = vmatpush3.bf16.msra.mxu0 %v1430_v24  ;;  %1324 = vmatpush3.bf16.msra.mxu1 %v1430_v24  ;;  %v740_v24 = vld [vmem:[%s1941_s3 + $0x28] sm:$0xff] (!%p1158_p6) }
  0x61   : > { %1235 = vmatprep.subr.bf16.mxu0 %v1431_v25  ;;  %1317 = vmatprep.subr.bf16.mxu1 %v1431_v25 }
  0x64   : > { %1236 = vmatpush3.bf16.msra.mxu0 %v1431_v25  ;;  %1325 = vmatpush3.bf16.msra.mxu1 %v1431_v25  ;;  %v687_v25 = vld [vmem:[%s1720_s21] sm:$0xff] (!%p1158_p6) }
  0x65   : > { %1237 = vmatprep.subr.bf16.mxu0 %v1432_v26  ;;  %1318 = vmatprep.subr.bf16.mxu1 %v1432_v26 }
  0x68   : > { %1238 = vmatpush3.bf16.msra.mxu0 %v1432_v26  ;;  %1326 = vmatpush3.bf16.msra.mxu1 %v1432_v26 }
  0x69   : > { %1296 = vmatprep.subr.bf16.mxu0 (!%p1158_p6), %v1295_v20  ;;  %1327 = vmatprep.subr.bf16.mxu1 (!%p1158_p6), %v1295_v20 }
  0x6b   : > { %1240 = vmatmul.mubr.bf16.vlgmr.msra.gmra.mrb[0].mxu0 %v1435_v27  ;;  %1248 = vmatmul.mubr.bf16.vlgmr.msra.gmra.mrb[0].mxu1 %v1436_v28  ;;  %v695_v27 = vld [vmem:[%s1720_s21 + $0x40] sm:$0xff] (!%p1158_p6) }
  0x6c   : > { %1243 = vmatprep.mubr.bf16.mxu0 %v1437_v29  ;;  %1251 = vmatprep.mubr.bf16.mxu1 %v1438_v30 }
  0x6d   : > { %1298 = vmatpush3.bf16.msra.mxu0 (!%p1158_p6), %v1295_v20  ;;  %1331 = vmatpush3.bf16.msra.mxu1 (!%p1158_p6), %v1295_v20 }
  0x6e   : > { %1300 = vmatprep.subr.bf16.mxu0 (!%p1158_p6), %v1299_v22  ;;  %1328 = vmatprep.subr.bf16.mxu1 (!%p1158_p6), %v1299_v22 }
  0x71   : > { %1302 = vmatpush3.bf16.msra.mxu0 (!%p1158_p6), %v1299_v22  ;;  %1332 = vmatpush3.bf16.msra.mxu1 (!%p1158_p6), %v1299_v22 }
  0x73   : > { %1244 = vmatmul.mubr.bf16.gmra.mrb[4].mxu0 %v1439_v31  ;;  %1252 = vmatmul.mubr.bf16.gmra.mrb[4].mxu1 %v1440_v32  ;;  %v1303_v31 = vpack.c.bf16 (!%p1158_p6), %v740_v24, %v739_v23  ;;  %v741_v32 = vld [vmem:[%s1941_s3 + $0x30] sm:$0xff] (!%p1158_p6) }
  0x75   : > { %1304 = vmatprep.subr.bf16.mxu0 (!%p1158_p6), %v1303_v31  ;;  %1329 = vmatprep.subr.bf16.mxu1 (!%p1158_p6), %v1303_v31 }
  0x76   : > { %1306 = vmatpush3.bf16.msra.mxu0 (!%p1158_p6), %v1303_v31  ;;  %1333 = vmatpush3.bf16.msra.mxu1 (!%p1158_p6), %v1303_v31 }
 0x13e   : > { %v1241_v37 = vpop.f32.mrb[0].mxu0  ;;  %v1249_v38 = vpop.f32.mrb[0].mxu1 }
 0x13f   : > { %v652_v41 = vadd.f32 %v1241_v37, %v411_v33  ;;  %v660_v42 = vadd.f32 %v1249_v38, %v419_v34  ;;  %v587_v43 = vpop.f32.mrb[1].mxu0  ;;  %v619_v44 = vpop.f32.mrb[1].mxu1  ;;  %v742_v33 = vld [vmem:[%s1941_s3 + $0x38] sm:$0xff] (!%p1158_p6)  ;;  %v696_v37 = vld [vmem:[%s1720_s21 + $0x48] sm:$0xff] (!%p1158_p6) }
 0x140   : > { %v650_v47 = vadd.f32 %v587_v43, %v409_v35  ;;  %v658_v48 = vadd.f32 %v619_v44, %v417_v36  ;;  %v1242_v49 = vpop.f32.mrb[2].mxu0  ;;  %v1250_v50 = vpop.f32.mrb[2].mxu1  ;;  %v1307_v34 = vpack.c.bf16 (!%p1158_p6), %v742_v33, %v741_v32  ;;  %v688_v35 = vld [vmem:[%s1720_s21 + $0x8] sm:$0xff] (!%p1158_p6) }
 0x141   : > { %669 = vst.msk [vmem:[#allocation2 + $0x10] sm:$0xff] %vm666_vm1, %v652_v41  ;;  %677 = vst.msk [vmem:[#allocation2 + $0x50] sm:$0xff] %vm666_vm1, %v660_v42  ;;  %v653_v51 = vadd.f32 %v1242_v49, %v412_v39  ;;  %v661_v52 = vadd.f32 %v1250_v50, %v420_v40  ;;  %v590_v53 = vpop.f32.mrb[3].mxu0  ;;  %v622_v54 = vpop.f32.mrb[3].mxu1  ;;  %v689_v39 = vld [vmem:[%s1720_s21 + $0x10] sm:$0xff] (!%p1158_p6)  ;;  %v698_v49 = vld [vmem:[%s1720_s21 + $0x58] sm:$0xff] (!%p1158_p6) }
 0x142   : > { %667 = vst.msk [vmem:[#allocation2] sm:$0xff] %vm666_vm1, %v650_v47  ;;  %675 = vst.msk [vmem:[#allocation2 + $0x40] sm:$0xff] %vm666_vm1, %v658_v48  ;;  %v651_v55 = vadd.f32 %v590_v53, %v410_v45  ;;  %v659_v56 = vadd.f32 %v622_v54, %v418_v46  ;;  %1308 = vmatprep.subr.bf16.mxu0 (!%p1158_p6), %v1307_v34  ;;  %1330 = vmatprep.subr.bf16.mxu1 (!%p1158_p6), %v1307_v34  ;;  %v697_v41 = vld [vmem:[%s1720_s21 + $0x50] sm:$0xff] (!%p1158_p6)  ;;  %v690_v45 = vld [vmem:[%s1720_s21 + $0x18] sm:$0xff] (!%p1158_p6) }
 0x143   : > { %670 = vst.msk [vmem:[#allocation2 + $0x18] sm:$0xff] %vm666_vm1, %v653_v51  ;;  %678 = vst.msk [vmem:[#allocation2 + $0x58] sm:$0xff] %vm666_vm1, %v661_v52  ;;  %1310 = vmatpush3.bf16.msra.mxu0 (!%p1158_p6), %v1307_v34  ;;  %1334 = vmatpush3.bf16.msra.mxu1 (!%p1158_p6), %v1307_v34  ;;  %v691_v51 = vld [vmem:[%s1720_s21 + $0x20] sm:$0xff] (!%p1158_p6) }
 0x144   : > { %668 = vst.msk [vmem:[#allocation2 + $0x8] sm:$0xff] %vm666_vm1, %v651_v55  ;;  %676 = vst.msk [vmem:[#allocation2 + $0x48] sm:$0xff] %vm666_vm1, %v659_v56  ;;  %v699_v53 = vld [vmem:[%s1720_s21 + $0x60] sm:$0xff] (!%p1158_p6) }
 0x146   : > { %v1245_v61 = vpop.f32.mrb[4].mxu0  ;;  %v1253_v62 = vpop.f32.mrb[4].mxu1  ;;  %686 = sbr.rel (%p1158_p6) target bundleno = 567 (0x237), region = 89 }
 0x147   : > { %v656_v1 = vadd.f32 %v1245_v61, %v415_v57  ;;  %v664_v2 = vadd.f32 %v1253_v62, %v423_v58  ;;  %v603_v3 = vpop.f32.mrb[5].mxu0  ;;  %v635_v4 = vpop.f32.mrb[5].mxu1  ;;  %v692_v57 = vld [vmem:[%s1720_s21 + $0x28] sm:$0xff] (!%p1158_p6) }
 0x148   : > { %v654_v7 = vadd.f32 %v603_v3, %v413_v59  ;;  %v662_v8 = vadd.f32 %v635_v4, %v421_v60  ;;  %v1246_v9 = vpop.f32.mrb[6].mxu0  ;;  %v1254_v10 = vpop.f32.mrb[6].mxu1  ;;  %v705_v40 = vld [vmem:[#allocation2 + $0x10] sm:$0xff] (!%p1158_p6)  ;;  %v700_v61 = vld [vmem:[%s1720_s21 + $0x68] sm:$0xff] (!%p1158_p6) }
 0x149   : > { %673 = vst.msk [vmem:[#allocation2 + $0x30] sm:$0xff] %vm666_vm1, %v656_v1  ;;  %681 = vst.msk [vmem:[#allocation2 + $0x70] sm:$0xff] %vm666_vm1, %v664_v2  ;;  %v657_v11 = vadd.f32 %v1246_v9, %v416_v63  ;;  %v665_v12 = vadd.f32 %v1254_v10, %v424_v0  ;;  %v606_v13 = vpop.f32.mrb[7].mxu0  ;;  %v638_v14 = vpop.f32.mrb[7].mxu1  ;;  %v703_v26 = vld [vmem:[#allocation2] sm:$0xff] (!%p1158_p6)  ;;  %v713_v42 = vld [vmem:[#allocation2 + $0x50] sm:$0xff] (!%p1158_p6)  ;;  %v721_v47 = vadd.f32 (!%p1158_p6), %v705_v40, %v689_v39 }
 0x14a   : > { %671 = vst.msk [vmem:[#allocation2 + $0x20] sm:$0xff] %vm666_vm1, %v654_v7  ;;  %679 = vst.msk [vmem:[#allocation2 + $0x60] sm:$0xff] %vm666_vm1, %v662_v8  ;;  %v655_v15 = vadd.f32 %v606_v13, %v414_v5  ;;  %v663_v16 = vadd.f32 %v638_v14, %v422_v6  ;;  %v711_v28 = vld [vmem:[#allocation2 + $0x40] sm:$0xff] (!%p1158_p6)  ;;  %v719_v29 = vadd.f32 (!%p1158_p6), %v703_v26, %v687_v25  ;;  %v706_v46 = vld [vmem:[#allocation2 + $0x18] sm:$0xff] (!%p1158_p6) }
 0x14b   : > { %674 = vst.msk [vmem:[#allocation2 + $0x38] sm:$0xff] %vm666_vm1, %v657_v11  ;;  %682 = vst.msk [vmem:[#allocation2 + $0x78] sm:$0xff] %vm666_vm1, %v665_v12  ;;  %v727_v30 = vadd.f32 (!%p1158_p6), %v711_v28, %v695_v27  ;;  %v704_v36 = vld [vmem:[#allocation2 + $0x8] sm:$0xff] (!%p1158_p6)  ;;  %v729_v48 = vadd.f32 (!%p1158_p6), %v713_v42, %v697_v41  ;;  %v714_v50 = vld [vmem:[#allocation2 + $0x58] sm:$0xff] (!%p1158_p6)  ;;  %v722_v55 = vadd.f32 (!%p1158_p6), %v706_v46, %v690_v45 }
 0x14c   : > { %672 = vst.msk [vmem:[#allocation2 + $0x28] sm:$0xff] %vm666_vm1, %v655_v15  ;;  %680 = vst.msk [vmem:[#allocation2 + $0x68] sm:$0xff] %vm666_vm1, %v663_v16  ;;  %1271 = vmatprep.mubr.msk.f32.mxu0 (!%p1158_p6), %vm666_vm1, %v719_v29  ;;  %v712_v38 = vld [vmem:[#allocation2 + $0x48] sm:$0xff] (!%p1158_p6)  ;;  %v720_v43 = vadd.f32 (!%p1158_p6), %v704_v36, %v688_v35  ;;  %v730_v56 = vadd.f32 (!%p1158_p6), %v714_v50, %v698_v49  ;;  %v693_v63 = vld [vmem:[%s1720_s21 + $0x30] sm:$0xff] (!%p1158_p6) }
 0x14d   : > { %1283 = vmatprep.mubr.msk.f32.mxu1 %vm666_vm1, %v727_v30  ;;  %v728_v44 = vadd.f32 %v712_v38, %v696_v37  ;;  %v701_v1 = vld [vmem:[%s1720_s21 + $0x70] sm:$0xff]  ;;  %v694_v5 = vld [vmem:[%s1720_s21 + $0x38] sm:$0xff]  ;;  %v1835_v13 = vld [vmem:[%s1942_s4] ss:$0 sm:$0xff] }
 0x14e   : > { %1272 = vmatmul.mubr.msk.f32.vlgmr.msra.gmra.mrb[0].mxu0 %vm666_vm1, %v720_v43  ;;  %v702_v9 = vld [vmem:[%s1720_s21 + $0x78] sm:$0xff] }
 0x14f   : > { %1284 = vmatmul.mubr.msk.f32.vlgmr.msra.gmra.mrb[0].mxu1 %vm666_vm1, %v728_v44  ;;  %1274 = vmatprep.mubr.msk.f32.mxu0 %vm666_vm1, %v721_v47 }
 0x150   : > { %1286 = vmatprep.mubr.msk.f32.mxu1 %vm666_vm1, %v729_v48  ;;  %v709_v0 = vld [vmem:[#allocation2 + $0x30] sm:$0xff] }
 0x151   : > { %v707_v52 = vld [vmem:[#allocation2 + $0x20] sm:$0xff]  ;;  %v717_v2 = vld [vmem:[#allocation2 + $0x70] sm:$0xff]  ;;  %v725_v6 = vadd.f32 %v709_v0, %v693_v63 }
 0x152   : > { %v715_v54 = vld [vmem:[#allocation2 + $0x60] sm:$0xff]  ;;  %v723_v59 = vadd.f32 %v707_v52, %v691_v51  ;;  %1275 = vmatmul.mubr.msk.f32.gmra.mrb[2].mxu0 %vm666_vm1, %v722_v55  ;;  %v733_v7 = vadd.f32 %v717_v2, %v701_v1  ;;  %v710_v8 = vld [vmem:[#allocation2 + $0x38] sm:$0xff] }
 0x153   : > { %v708_v58 = vld [vmem:[#allocation2 + $0x28] sm:$0xff]  ;;  %v731_v60 = vadd.f32 %v715_v54, %v699_v53  ;;  %1287 = vmatmul.mubr.msk.f32.gmra.mrb[2].mxu1 %vm666_vm1, %v730_v56  ;;  %v718_v10 = vld [vmem:[#allocation2 + $0x78] sm:$0xff]  ;;  %v726_v11 = vadd.f32 %v710_v8, %v694_v5 }
 0x154   : > { %v716_v62 = vld [vmem:[#allocation2 + $0x68] sm:$0xff]  ;;  %v724_v3 = vadd.f32 %v708_v58, %v692_v57  ;;  %1277 = vmatprep.mubr.msk.f32.mxu0 %vm666_vm1, %v723_v59  ;;  %v734_v12 = vadd.f32 %v718_v10, %v702_v9 }
 0x155   : > { %v732_v4 = vadd.f32 %v716_v62, %v700_v61  ;;  %1289 = vmatprep.mubr.msk.f32.mxu1 %vm666_vm1, %v731_v60 }
 0x156   : > { %1278 = vmatmul.mubr.msk.f32.gmra.mrb[4].mxu0 %vm666_vm1, %v724_v3 }
 0x157   : > { %1290 = vmatmul.mubr.msk.f32.gmra.mrb[4].mxu1 %vm666_vm1, %v732_v4  ;;  %1280 = vmatprep.mubr.msk.f32.mxu0 %vm666_vm1, %v725_v6 }
 0x158   : > { %1292 = vmatprep.mubr.msk.f32.mxu1 %vm666_vm1, %v733_v7 }
 0x15a   : > { %1281 = vmatmul.mubr.msk.f32.gmra.mrb[6].mxu0 %vm666_vm1, %v726_v11 }
 0x15b   : > { %1293 = vmatmul.mubr.msk.f32.gmra.mrb[6].mxu1 %vm666_vm1, %v734_v12 }
 0x221   : > { %v1273_v14 = vpop.f32.mrb[0].mxu0 }
 0x222   : > { %v1285_v15 = vpop.f32.mrb[0].mxu1  ;;  %v870_v16 = vadd.f32 %v1273_v14, %v1835_v13  ;;  %v864_v18 = vpop.f32.mrb[1].mxu0 }
 0x223   : > { %v910_v17 = vadd.f32 %v1285_v15, %v1835_v13  ;;  %v904_v19 = vpop.f32.mrb[1].mxu1  ;;  %v865_v20 = vadd.f32 %v1835_v13, %v864_v18 }
 0x224   : > { %v905_v21 = vadd.f32 %v1835_v13, %v904_v19  ;;  %vm944_vm2 = vcmp.ge.f32.partialorder %v870_v16, 0.0  ;;  %v960_v22 = vmul.f32 0.01, %v870_v16 }
 0x225   : > { %vm952_vm3 = vcmp.ge.f32.partialorder %v910_v17, 0.0  ;;  %v968_v23 = vmul.f32 0.01, %v910_v17  ;;  %vm943_vm4 = vcmp.ge.f32.partialorder %v865_v20, 0.0  ;;  %v959_v24 = vmul.f32 0.01, %v865_v20 }
 0x226   : > { %vm951_vm5 = vcmp.ge.f32.partialorder %v905_v21, 0.0  ;;  %v967_v25 = vmul.f32 0.01, %v905_v21  ;;  %v976_v26 = vsel %vm944_vm2, %v870_v16, %v960_v22  ;;  %v1276_v28 = vpop.f32.mrb[2].mxu0  ;;  %v1288_v29 = vpop.f32.mrb[2].mxu1 }
 0x227   : > { %v984_v27 = vsel %vm952_vm3, %v910_v17, %v968_v23  ;;  %992 = vst [vmem:[%s1724_s9 + $0x8] sm:$0xff] %v976_v26  ;;  %v975_v30 = vsel %vm943_vm4, %v865_v20, %v959_v24  ;;  %v880_v32 = vadd.f32 %v1276_v28, %v1835_v13  ;;  %v920_v33 = vadd.f32 %v1288_v29, %v1835_v13  ;;  %v874_v34 = vpop.f32.mrb[3].mxu0  ;;  %v914_v35 = vpop.f32.mrb[3].mxu1 }
 0x228   : > { %1000 = vst [vmem:[%s1724_s9 + $0x48] sm:$0xff] %v984_v27  ;;  %v983_v31 = vsel %vm951_vm5, %v905_v21, %v967_v25  ;;  %991 = vst [vmem:[%s1724_s9] sm:$0xff] %v975_v30  ;;  %v875_v36 = vadd.f32 %v1835_v13, %v874_v34  ;;  %v915_v37 = vadd.f32 %v1835_v13, %v914_v35 }
 0x229   : > { %999 = vst [vmem:[%s1724_s9 + $0x40] sm:$0xff] %v983_v31  ;;  %vm946_vm6 = vcmp.ge.f32.partialorder %v880_v32, 0.0  ;;  %v962_v38 = vmul.f32 0.01, %v880_v32  ;;  %vm954_vm7 = vcmp.ge.f32.partialorder %v920_v33, 0.0  ;;  %v1279_v44 = vpop.f32.mrb[4].mxu0 }
 0x22a   : > { %v970_v39 = vmul.f32 0.01, %v920_v33  ;;  %vm945_vm8 = vcmp.ge.f32.partialorder %v875_v36, 0.0  ;;  %v961_v40 = vmul.f32 0.01, %v875_v36  ;;  %vm953_vm9 = vcmp.ge.f32.partialorder %v915_v37, 0.0 }
 0x22b   : > { %v969_v41 = vmul.f32 0.01, %v915_v37  ;;  %v978_v42 = vsel %vm946_vm6, %v880_v32, %v962_v38  ;;  %v1291_v45 = vpop.f32.mrb[4].mxu1  ;;  %v890_v48 = vadd.f32 %v1279_v44, %v1835_v13  ;;  %v884_v50 = vpop.f32.mrb[5].mxu0 }
 0x22c   : > { %v986_v43 = vsel %vm954_vm7, %v920_v33, %v970_v39  ;;  %994 = vst [vmem:[%s1724_s9 + $0x18] sm:$0xff] %v978_v42  ;;  %v977_v46 = vsel %vm945_vm8, %v875_v36, %v961_v40  ;;  %v930_v49 = vadd.f32 %v1291_v45, %v1835_v13  ;;  %v924_v51 = vpop.f32.mrb[5].mxu1  ;;  %v885_v52 = vadd.f32 %v1835_v13, %v884_v50 }
 0x22d   : > { %1002 = vst [vmem:[%s1724_s9 + $0x58] sm:$0xff] %v986_v43  ;;  %v985_v47 = vsel %vm953_vm9, %v915_v37, %v969_v41  ;;  %993 = vst [vmem:[%s1724_s9 + $0x10] sm:$0xff] %v977_v46  ;;  %v925_v53 = vadd.f32 %v1835_v13, %v924_v51  ;;  %v1282_v54 = vpop.f32.mrb[6].mxu0  ;;  %vm948_vm10 = vcmp.ge.f32.partialorder %v890_v48, 0.0  ;;  %v964_v56 = vmul.f32 0.01, %v890_v48 }
 0x22e   : > { %1001 = vst [vmem:[%s1724_s9 + $0x50] sm:$0xff] %v985_v47  ;;  %v1294_v55 = vpop.f32.mrb[6].mxu1  ;;  %vm956_vm11 = vcmp.ge.f32.partialorder %v930_v49, 0.0  ;;  %v972_v57 = vmul.f32 0.01, %v930_v49  ;;  %vm947_vm12 = vcmp.ge.f32.partialorder %v885_v52, 0.0  ;;  %v900_v62 = vadd.f32 %v1282_v54, %v1835_v13 }
 0x22f   : > { %v963_v58 = vmul.f32 0.01, %v885_v52  ;;  %vm955_vm13 = vcmp.ge.f32.partialorder %v925_v53, 0.0  ;;  %v971_v59 = vmul.f32 0.01, %v925_v53  ;;  %v980_v60 = vsel %vm948_vm10, %v890_v48, %v964_v56  ;;  %v894_v0 = vpop.f32.mrb[7].mxu0 }
 0x230   : > { %v988_v61 = vsel %vm956_vm11, %v930_v49, %v972_v57  ;;  %v940_v63 = vadd.f32 %v1294_v55, %v1835_v13  ;;  %v934_v1 = vpop.f32.mrb[7].mxu1  ;;  %996 = vst [vmem:[%s1724_s9 + $0x28] sm:$0xff] %v980_v60  ;;  %v895_v4 = vadd.f32 %v1835_v13, %v894_v0  ;;  %vm950_vm14 = vcmp.ge.f32.partialorder %v900_v62, 0.0 }
 0x231   : > { %1004 = vst [vmem:[%s1724_s9 + $0x68] sm:$0xff] %v988_v61  ;;  %v979_v2 = vsel %vm947_vm12, %v885_v52, %v963_v58  ;;  %v987_v3 = vsel %vm955_vm13, %v925_v53, %v971_v59  ;;  %v935_v5 = vadd.f32 %v1835_v13, %v934_v1  ;;  %v966_v6 = vmul.f32 0.01, %v900_v62 }
 0x232   : > { %995 = vst [vmem:[%s1724_s9 + $0x20] sm:$0xff] %v979_v2  ;;  %1003 = vst [vmem:[%s1724_s9 + $0x60] sm:$0xff] %v987_v3  ;;  %vm958_vm15 = vcmp.ge.f32.partialorder %v940_v63, 0.0  ;;  %v974_v7 = vmul.f32 0.01, %v940_v63  ;;  %vm949_vm0 = vcmp.ge.f32.partialorder %v895_v4, 0.0 }
 0x233   : > { %v965_v8 = vmul.f32 0.01, %v895_v4  ;;  %vm957_vm1 = vcmp.ge.f32.partialorder %v935_v5, 0.0  ;;  %v973_v9 = vmul.f32 0.01, %v935_v5  ;;  %v982_v10 = vsel %vm950_vm14, %v900_v62, %v966_v6 }
 0x234   : > { %v990_v11 = vsel %vm958_vm15, %v940_v63, %v974_v7  ;;  %998 = vst [vmem:[%s1724_s9 + $0x38] sm:$0xff] %v982_v10 }
 0x235   : > { %1006 = vst [vmem:[%s1724_s9 + $0x78] sm:$0xff] %v990_v11  ;;  %v981_v12 = vsel %vm949_vm0, %v895_v4, %v965_v8  ;;  %v989_v14 = vsel %vm957_vm1, %v935_v5, %v973_v9 }
 0x236   : > { %997 = vst [vmem:[%s1724_s9 + $0x30] sm:$0xff] %v981_v12  ;;  %1005 = vst [vmem:[%s1724_s9 + $0x70] sm:$0xff] %v989_v14 }
 0x237 PF: > { %s1182_s21 = sshll.u32 %s1539_s24, 11  ;;  %s1021_s23 = sshll.u32 %s1724_s9, 4  ;;  %s1876_s23 = int_to_ptr.vmem [resolvable:$true] %s1021_s23 }
 0x238   : > { %s1873_s12 = scalar_lea.hbm %s1943_s5, %s1182_s21  ;;  %s1956_s13 = sand.u32 1, %s1519_s19  }
 0x239   : > { %s1880_s10 = scalar_lea.sflag [#allocation5], %s1956_s13  ;;  %s1441_s7 = scalar_lea.vmem %s1876_s23, 2048 }
 0x23a   : > { %p1442_p8 = scmp.ne.s32.totalorder %s1876_s23, %s1441_s7  ;;  %s1554_s24 = smov [#allocation4]  }
 0x23b   : > { %s1445_s6 = sshll.u32 %s1554_s24, 4  ;;  %s1446_s6 = int_to_ptr.vmem [resolvable:$false] %s1445_s6 }
 0x23c   : > { %p1443_p9 = pnand %p1442_p8, %p1659_p7  ;;  %s1447_s0 = scalar_lea.vmem %s1446_s6, 4096 }
 0x23d   : > { %p1448_p11 = scmp.lt.s32.totalorder %s1876_s23, %s1446_s6  ;;  %p1449_p13 = scmp.lt.s32.totalorder %s1447_s0, %s1441_s7 }
 0x23e   : > { %p1444_p10 = pneg %p1443_p9 }
 0x23f   : > { %p1450_p0 = por %p1449_p13, %p1448_p11 }
 0x241   : > { %p1451_p1 = pnand %p1450_p0, %p1444_p10 }
 0x243   : > { %1454 = shalt.err (!%p1451_p1)
}
 0x244   : > { %s1455_s9 = scalar_lea.hbm %s1873_s12, 2048  ;;  %s1459_s17 = scalar_lea.hbm %s1943_s5, 4096 }
 0x245   : > { %p1456_p2 = scmp.ne.s32.totalorder %s1873_s12, %s1455_s9  ;;  %p1460_p5 = scmp.lt.u32.totalorder %s1873_s12, %s1943_s5 }
 0x246   : > { %p1461_p6 = scmp.lt.u32.totalorder %s1459_s17, %s1455_s9  ;;  %p1463_p9 = scmp.lt.u32.totalorder %s1455_s9, %s1873_s12 }
 0x247   : > { %p1457_p3 = pnand %p1456_p2, %p1659_p7 }
 0x248   : > { %p1462_p8 = por %p1461_p6, %p1460_p5 }
 0x249   : > { %p1458_p4 = pneg %p1457_p3 }
 0x24a   : > { %p1464_p10 = por %p1463_p9, %p1462_p8 }
 0x24c   : > { %p1465_p11 = pnand %p1464_p10, %p1458_p4 }
 0x24e   : > { %1468 = shalt.err (!%p1465_p11)
}
 0x24f   : > { %s1555_s29 = smov 128   ;;  %s1556_s8 = smov 8  }
 0x250   : > { %1335 = dma.vmem_to_hbm [thread:$0]  (%p1659_p7), %s1876_s23, 2048, %s1873_s12, %s1880_s10, %s1555_s29, %s1555_s29, %s1556_s8  }
 0x251 PF: > { %p1341_p13 = scmp.ge.s32.totalorder %s1551_s27, 2  ;;  %s1036_s13 = sand.u32 1, %s1515_s18  }
 0x252   : > { %s1037_s7 = scalar_lea.sflag [#allocation5], %s1036_s13 }
 0x253   : > { %p1338_p0 = pnand %p1341_p13, %p1667_p12 }
 0x255   : > { %1510 = dma.done.wait (!%p1338_p0), %s1037_s7, 2048  }
 0x256   : > { %1512 = vsyncadd (!%p1338_p0), %s1037_s7, 4294965248  ;;  %s18_s27 = sadd.s32 1, %s1551_s27   ;;  %s1957_s24 = sld [smem:[#allocation7_spill]] }
 0x257   : > { %p15_p1 = scmp.ge.s32.totalorder %s18_s27, 6   ;;  %s1958_s11 = sld [smem:[#allocation8_spill]] }
 0x258   : > { %s1959_s26 = sld [smem:[#allocation9_spill]]  ;;  %s1960_s18 = smov %s1519_s19 }
 0x259   : > { %s1961_s19 = smov %s1523_s20  ;;  %s1962_s20 = smov %s1672_s15 }
 0x25a   : > { %s1963_s21 = smov %s1531_s22  ;;  %s1964_s22 = smov %s1675_s16 }
 0x25b   : > { %s1965_s23 = smov %s1543_s25  ;;  %17 = sbr.rel (!%p15_p1) target bundleno = 8 (0x8), region = 135 }
 0x25d   : > { %s1966_s25 = smov %s1958_s11 }
 0x262   :  { %1042 = vsyncpa [#allocation5], 1 }
 0x263   :  { %1044 = vsyncpa [#allocation5 + $0x1], 1 }

</bundles_post_ra>
